<compile_context>
chip_gen: v6e
topology: v6e:2x2x1
jax: 0.10.0
libtpu: 0.0.40
codegen_flags: <defaults>
</compile_context>

<pallas_src>
import jax
import jax.numpy as jnp
from jax.experimental import pallas as pl
from jax.experimental.pallas import tpu as pltpu

# Small shapes consistent with the module's forward signature.
B, S, H, V = 2, 8, 32, 64          # logical batch, seq len, hidden, vocab
BP = 8                             # batch padded to one full sublane group
HP = 128                           # hidden padded to one full lane width
VP = 128                           # vocab padded to one full lane width
DROPOUT_RATE = 0.1                 # nn.Dropout(dropout_rate), training mode
LN_EPS = 1e-5                      # PyTorch nn.LayerNorm default eps


def encoder_head_kernel(ids_ref, mask_ref, keep_ref, params_ref,
                        emb_ref, wp_ref, wl_ref, out_ref):
    # Coalesced (8, HP) parameter block: rows = [bp, gamma, beta, bl, 0...].
    bp    = params_ref[0:1, :]
    gamma = params_ref[1:2, :]
    beta  = params_ref[2:3, :]
    bl    = params_ref[3:4, :]

    # ---- synthetic encoder: embedding gather + masked mean pooling -------
    # TODO(synk): pretrained AutoModel internals are not reproducible; the
    # stand-in pooler is embedding -> attention-masked mean -> dense -> tanh.
    ids = ids_ref[...]                                      # (BP, S) int32
    mask = mask_ref[...]                                    # (BP, S) f32
    vocab_iota = jax.lax.broadcasted_iota(jnp.int32, (BP, S, VP), 2)
    onehot = (ids[:, :, None] == vocab_iota).astype(jnp.float32)  # (BP,S,VP)
    w_bv = jnp.sum(onehot * mask[:, :, None], axis=1)       # (BP, VP) counts
    msum = jnp.maximum(jnp.sum(mask, axis=1, keepdims=True), 1.0)  # (BP, 1)
    inv_msum = pl.reciprocal(msum, approx=True)             # EUP, ~free
    # Gather + masked-sum pooling as a single bf16 MXU matmul (counts <= S
    # are exact in bf16), f32 accumulation.
    pooled = jnp.dot(w_bv.astype(jnp.bfloat16), emb_ref[...],
                     preferred_element_type=jnp.float32) * inv_msum  # (BP,HP)
    # BERT-style pooler head: dense (weight pre-transposed [in,out]) + tanh.
    pooled = jnp.tanh(
        jnp.dot(pooled.astype(jnp.bfloat16), wp_ref[...],
                preferred_element_type=jnp.float32) + bp)   # (BP, HP)

    # ---- LayerNorm over the logical H lanes (biased var, PyTorch eps) ----
    lane = jax.lax.broadcasted_iota(jnp.int32, (BP, HP), 1)
    lmask = (lane < H).astype(jnp.float32)
    pooled = pooled * lmask                  # don't rely on zero padded lanes
    mu = jnp.sum(pooled, axis=-1, keepdims=True) * (1.0 / H)
    diff = (pooled - mu) * lmask
    var = jnp.sum(diff * diff, axis=-1, keepdims=True) * (1.0 / H)
    xn = diff * jax.lax.rsqrt(var + LN_EPS)
    xn = xn * gamma + beta                   # gamma/beta zero-padded lanes

    # ---- Dropout: multiply by {0,1} keep mask; 1/(1-p) folded into wl -----
    xd = xn * keep_ref[...]

    # ---- Final Linear (weight pre-transposed + pre-scaled), lane-dense ----
    out_ref[...] = (
        jnp.dot(xd.astype(jnp.bfloat16), wl_ref[...],
                preferred_element_type=jnp.float32) + bl
    ).astype(out_ref.dtype)


def dpr_head(input_ids_p, attention_mask_p, keep_p, params, emb_p, wp_t, wl_t):
    vmem = pl.BlockSpec(memory_space=pltpu.MemorySpace.VMEM)
    out_padded = pl.pallas_call(
        encoder_head_kernel,
        out_shape=jax.ShapeDtypeStruct((BP, HP), jnp.float32),
        in_specs=[vmem] * 7,
        out_specs=vmem,
    )(input_ids_p, attention_mask_p, keep_p, params, emb_p, wp_t, wl_t)
    return out_padded[:B, :H]      # drop sublane + lane padding outside


def _pad_to(x, shape):
    return jnp.pad(x, [(0, t - s) for s, t in zip(x.shape, shape)])


if __name__ == "__main__":
    key = jax.random.PRNGKey(0)
    k_emb, k_ids, k_wp, k_wl, k_bl, k_drop = jax.random.split(key, 6)

    # Deterministic synthetic parameters (shapes implied by the module).
    emb_table = jax.random.normal(k_emb, (V, H), jnp.float32) * 0.02
    wp = jax.random.normal(k_wp, (H, H), jnp.float32) * 0.02   # pooler dense [out,in]
    bp = jnp.zeros((H,), jnp.float32)
    gamma = jnp.ones((H,), jnp.float32)                        # LayerNorm weight
    beta = jnp.zeros((H,), jnp.float32)                        # LayerNorm bias
    wl = jax.random.normal(k_wl, (H, H), jnp.float32) * 0.02   # final Linear [out,in]
    bl = jax.random.normal(k_bl, (H,), jnp.float32) * 0.02

    # Forward inputs: input_ids and attention_mask, shape (B, S).
    input_ids = jax.random.randint(k_ids, (B, S), 0, V, dtype=jnp.int32)
    attention_mask = jnp.ones((B, S), jnp.float32).at[1, 5:].set(0.0)

    # Dropout keep-mask (training semantics); 1/(1-p) rescale folded into wl.
    keep = jax.random.bernoulli(
        k_drop, 1.0 - DROPOUT_RATE, (B, HP)).astype(jnp.float32)

    # ---- one-time wrapper-side prep ---------------------------------------
    # Sublane-pad batch 2 -> 8 (padded rows: ids=0, mask=0, keep=0).
    input_ids_p      = _pad_to(input_ids, (BP, S))
    attention_mask_p = _pad_to(attention_mask, (BP, S))
    keep_p           = _pad_to(keep, (BP, HP))

    # Lane-pad hidden H -> HP and vocab V -> VP; transpose weights to
    # [in, out]; cast matrix operands to bf16 (f32 accumulation in-kernel).
    emb_p = _pad_to(emb_table, (VP, HP)).astype(jnp.bfloat16)        # (VP, HP)
    wp_t  = _pad_to(wp.T, (HP, HP)).astype(jnp.bfloat16)             # (HP, HP)
    wl_t  = (_pad_to(wl.T, (HP, HP))
             * (1.0 / (1.0 - DROPOUT_RATE))).astype(jnp.bfloat16)    # (HP, HP)

    # Coalesce the four (1, HP) vectors into one (8, HP) params block.
    params = jnp.zeros((8, HP), jnp.float32)
    params = params.at[0, :H].set(bp)
    params = params.at[1, :H].set(gamma)
    params = params.at[2, :H].set(beta)
    params = params.at[3, :H].set(bl)

    out = dpr_head(input_ids_p, attention_mask_p, keep_p, params,
                   emb_p, wp_t, wl_t)
    out = jax.block_until_ready(out)
    assert out.shape == (B, H) and out.dtype == jnp.float32
    assert bool(jnp.all(jnp.isfinite(out)))
    print("KERNEL_OK")
</pallas_src>

<mosaic_0001>
module attributes {stable_mosaic.version = 11 : i64} {
  func.func @encoder_head_kernel(%arg0: memref<8x8xi32, #tpu.memory_space<vmem>>, %arg1: memref<8x8xf32, #tpu.memory_space<vmem>>, %arg2: memref<8x128xf32, #tpu.memory_space<vmem>>, %arg3: memref<8x128xf32, #tpu.memory_space<vmem>>, %arg4: memref<128x128xbf16, #tpu.memory_space<vmem>>, %arg5: memref<128x128xbf16, #tpu.memory_space<vmem>>, %arg6: memref<128x128xbf16, #tpu.memory_space<vmem>>, %arg7: memref<8x128xf32, #tpu.memory_space<vmem>>) attributes {dimension_semantics = [], scalar_prefetch = 0 : i64, scratch_operands = 0 : i64, tpu.core_type = #tpu.core_type<tc>} {
    %c0 = arith.constant 0 : index
    %c0_0 = arith.constant 0 : index
    %0 = vector.load %arg3[%c0, %c0_0] : memref<8x128xf32, #tpu.memory_space<vmem>>, vector<1x128xf32>
    %c1 = arith.constant 1 : index
    %c0_1 = arith.constant 0 : index
    %1 = vector.load %arg3[%c1, %c0_1] : memref<8x128xf32, #tpu.memory_space<vmem>>, vector<1x128xf32>
    %c2 = arith.constant 2 : index
    %c0_2 = arith.constant 0 : index
    %2 = vector.load %arg3[%c2, %c0_2] : memref<8x128xf32, #tpu.memory_space<vmem>>, vector<1x128xf32>
    %c3 = arith.constant 3 : index
    %c0_3 = arith.constant 0 : index
    %3 = vector.load %arg3[%c3, %c0_3] : memref<8x128xf32, #tpu.memory_space<vmem>>, vector<1x128xf32>
    %c0_4 = arith.constant 0 : index
    %c0_5 = arith.constant 0 : index
    %4 = vector.load %arg0[%c0_4, %c0_5] : memref<8x8xi32, #tpu.memory_space<vmem>>, vector<8x8xi32>
    %c0_6 = arith.constant 0 : index
    %c0_7 = arith.constant 0 : index
    %5 = vector.load %arg1[%c0_6, %c0_7] : memref<8x8xf32, #tpu.memory_space<vmem>>, vector<8x8xf32>
    %6 = tpu.iota {dimensions = array<i32: 2>} : vector<8x8x128xi32>
    %7 = vector.shape_cast %4 : vector<8x8xi32> to vector<8x8x1xi32>
    %8 = vector.broadcast %7 : vector<8x8x1xi32> to vector<8x8x128xi32>
    %9 = arith.cmpi eq, %8, %6 : vector<8x8x128xi32>
    %10 = arith.extui %9 : vector<8x8x128xi1> to vector<8x8x128xi32>
    %11 = arith.sitofp %10 : vector<8x8x128xi32> to vector<8x8x128xf32>
    %12 = vector.shape_cast %5 : vector<8x8xf32> to vector<8x8x1xf32>
    %13 = vector.broadcast %12 : vector<8x8x1xf32> to vector<8x8x128xf32>
    %14 = arith.mulf %11, %13 : vector<8x8x128xf32>
    %cst = arith.constant dense<0.000000e+00> : vector<8x128xf32>
    %15 = vector.multi_reduction <add>, %14, %cst [1] : vector<8x8x128xf32> to vector<8x128xf32>
    %cst_8 = arith.constant dense<0.000000e+00> : vector<8xf32>
    %16 = vector.multi_reduction <add>, %5, %cst_8 [1] : vector<8x8xf32> to vector<8xf32>
    %17 = vector.shape_cast %16 : vector<8xf32> to vector<8x1xf32>
    %cst_9 = arith.constant 1.000000e+00 : f32
    %18 = vector.broadcast %cst_9 : f32 to vector<8x1xf32>
    %19 = arith.maximumf %17, %18 : vector<8x1xf32>
    %20 = tpu.reciprocal %19 {approx = true} : vector<8x1xf32> -> vector<8x1xf32>
    %21 = arith.truncf %15 : vector<8x128xf32> to vector<8x128xbf16>
    %c0_10 = arith.constant 0 : index
    %c0_11 = arith.constant 0 : index
    %22 = vector.load %arg4[%c0_10, %c0_11] : memref<128x128xbf16, #tpu.memory_space<vmem>>, vector<128x128xbf16>
    %cst_12 = arith.constant dense<0.000000e+00> : vector<8x128xf32>
    %23 = tpu.matmul %21, %22, %cst_12 {dimension_numbers = #tpu.dot_dimension_numbers<[1], [0], [0], [1], [0, 0, 1, 1], [], []>} : vector<8x128xbf16>, vector<128x128xbf16>, vector<8x128xf32> -> vector<8x128xf32>
    %24 = vector.broadcast %20 : vector<8x1xf32> to vector<8x128xf32>
    %25 = arith.mulf %23, %24 : vector<8x128xf32>
    %26 = arith.truncf %25 : vector<8x128xf32> to vector<8x128xbf16>
    %c0_13 = arith.constant 0 : index
    %c0_14 = arith.constant 0 : index
    %27 = vector.load %arg5[%c0_13, %c0_14] : memref<128x128xbf16, #tpu.memory_space<vmem>>, vector<128x128xbf16>
    %cst_15 = arith.constant dense<0.000000e+00> : vector<8x128xf32>
    %28 = tpu.matmul %26, %27, %cst_15 {dimension_numbers = #tpu.dot_dimension_numbers<[1], [0], [0], [1], [0, 0, 1, 1], [], []>} : vector<8x128xbf16>, vector<128x128xbf16>, vector<8x128xf32> -> vector<8x128xf32>
    %29 = vector.broadcast %0 : vector<1x128xf32> to vector<8x128xf32>
    %30 = arith.addf %28, %29 : vector<8x128xf32>
    %31 = math.tanh %30 : vector<8x128xf32>
    %32 = tpu.iota {dimensions = array<i32: 1>} : vector<8x128xi32>
    %c32_i32 = arith.constant 32 : i32
    %33 = vector.broadcast %c32_i32 : i32 to vector<8x128xi32>
    %34 = arith.cmpi slt, %32, %33 : vector<8x128xi32>
    %35 = arith.extui %34 : vector<8x128xi1> to vector<8x128xi32>
    %36 = arith.sitofp %35 : vector<8x128xi32> to vector<8x128xf32>
    %37 = arith.mulf %31, %36 : vector<8x128xf32>
    %cst_16 = arith.constant dense<0.000000e+00> : vector<8xf32>
    %38 = vector.multi_reduction <add>, %37, %cst_16 [1] : vector<8x128xf32> to vector<8xf32>
    %39 = vector.shape_cast %38 : vector<8xf32> to vector<8x1xf32>
    %cst_17 = arith.constant 3.125000e-02 : f32
    %40 = vector.broadcast %cst_17 : f32 to vector<8x1xf32>
    %41 = arith.mulf %39, %40 : vector<8x1xf32>
    %42 = vector.broadcast %41 : vector<8x1xf32> to vector<8x128xf32>
    %43 = arith.subf %37, %42 : vector<8x128xf32>
    %44 = arith.mulf %43, %36 : vector<8x128xf32>
    %45 = arith.mulf %44, %44 : vector<8x128xf32>
    %cst_18 = arith.constant dense<0.000000e+00> : vector<8xf32>
    %46 = vector.multi_reduction <add>, %45, %cst_18 [1] : vector<8x128xf32> to vector<8xf32>
    %47 = vector.shape_cast %46 : vector<8xf32> to vector<8x1xf32>
    %cst_19 = arith.constant 3.125000e-02 : f32
    %48 = vector.broadcast %cst_19 : f32 to vector<8x1xf32>
    %49 = arith.mulf %47, %48 : vector<8x1xf32>
    %cst_20 = arith.constant 9.99999974E-6 : f32
    %50 = vector.broadcast %cst_20 : f32 to vector<8x1xf32>
    %51 = arith.addf %49, %50 : vector<8x1xf32>
    %52 = math.rsqrt %51 : vector<8x1xf32>
    %53 = vector.broadcast %52 : vector<8x1xf32> to vector<8x128xf32>
    %54 = arith.mulf %44, %53 : vector<8x128xf32>
    %55 = vector.broadcast %1 : vector<1x128xf32> to vector<8x128xf32>
    %56 = arith.mulf %54, %55 : vector<8x128xf32>
    %57 = vector.broadcast %2 : vector<1x128xf32> to vector<8x128xf32>
    %58 = arith.addf %56, %57 : vector<8x128xf32>
    %c0_21 = arith.constant 0 : index
    %c0_22 = arith.constant 0 : index
    %59 = vector.load %arg2[%c0_21, %c0_22] : memref<8x128xf32, #tpu.memory_space<vmem>>, vector<8x128xf32>
    %60 = arith.mulf %58, %59 : vector<8x128xf32>
    %61 = arith.truncf %60 : vector<8x128xf32> to vector<8x128xbf16>
    %c0_23 = arith.constant 0 : index
    %c0_24 = arith.constant 0 : index
    %62 = vector.load %arg6[%c0_23, %c0_24] : memref<128x128xbf16, #tpu.memory_space<vmem>>, vector<128x128xbf16>
    %cst_25 = arith.constant dense<0.000000e+00> : vector<8x128xf32>
    %63 = tpu.matmul %61, %62, %cst_25 {dimension_numbers = #tpu.dot_dimension_numbers<[1], [0], [0], [1], [0, 0, 1, 1], [], []>} : vector<8x128xbf16>, vector<128x128xbf16>, vector<8x128xf32> -> vector<8x128xf32>
    %64 = vector.broadcast %3 : vector<1x128xf32> to vector<8x128xf32>
    %65 = arith.addf %63, %64 : vector<8x128xf32>
    %c0_26 = arith.constant 0 : index
    %c0_27 = arith.constant 0 : index
    %66 = vector.load %arg7[%c0_26, %c0_27] : memref<8x128xf32, #tpu.memory_space<vmem>>, vector<8x128xf32>
    tpu.vector_store %arg7[%c0_26, %c0_27], %65 {strides = array<i32>} : memref<8x128xf32, #tpu.memory_space<vmem>>, vector<8x128xf32>,
    return
  }
}

</mosaic_0001>

<bundles_post_ra>
// kernel: tpu_custom_call.1
= control target key start
LH: loop header
LB: loop body
LE: loop exit
PB: predicated region body
PF: predicated region fallthrough
CT: control target
= control target key end

     0   :  { %12 = vsyncpa [#allocation3], 0  ;;  %s1216_s0 = inlined_call_operand.hbm [shape: s32[8,8], index: 0, kind: input, shape index: {}]   ;;  %s1217_s1 = inlined_call_operand.hbm [shape: f32[8,8], index: 1, kind: input, shape index: {}]   ;;  %s1218_s2 = inlined_call_operand.hbm [shape: f32[8,128], index: 2, kind: input, shape index: {}]   ;;  %s1219_s3 = inlined_call_operand.hbm [shape: f32[8,128], index: 3, kind: input, shape index: {}]   ;;  %s1220_s4 = inlined_call_operand.hbm [shape: bf16[128,128], index: 4, kind: input, shape index: {}]   ;;  %s1221_s5 = inlined_call_operand.hbm [shape: bf16[128,128], index: 5, kind: input, shape index: {}]   ;;  %s1222_s6 = inlined_call_operand.hbm [shape: bf16[128,128], index: 6, kind: input, shape index: {}]   ;;  %s1223_s7 = inlined_call_operand.hbm [shape: f32[8,128], index: 7, kind: output, shape index: {}]  }
   0x1   :  { %13 = vsyncpa [#allocation6], 0 }
   0x2   :  { %14 = vsyncpa [#allocation9], 0 }
   0x3   :  { %15 = vsyncpa [#allocation12], 0 }
   0x4   :  { %16 = vsyncpa [#allocation4], 0  ;;  %s1068_s24 = smov [#allocation5]   ;;  %s1069_s26 = smov [#allocation8]  }
   0x5   :  { %s33_s25 = sshll.u32 %s1068_s24, 4  ;;  %s53_s27 = sshll.u32 %s1069_s26, 4  ;;  %s34_s25 = int_to_ptr.vmem [resolvable:$true] %s33_s25  ;;  %s54_s27 = int_to_ptr.vmem [resolvable:$true] %s53_s27 }
   0x6   :  { %s906_s28 = scalar_lea.vmem %s34_s25, 128  ;;  %p911_p1 = scmp.lt.s32.totalorder %s34_s25, %s34_s25 }
   0x7   :  { %p907_p0 = scmp.ne.s32.totalorder %s34_s25, %s906_s28  ;;  %p912_p2 = scmp.lt.s32.totalorder %s906_s28, %s906_s28 }
   0x9   :  { %p913_p3 = por %p912_p2, %p911_p1 }
   0xb   :  { %p914_p4 = pnand %p913_p3, %p907_p0 }
   0xd   :  { %917 = shalt.err (!%p914_p4)
}
   0xe   :  { %36 = dma.hbm_to_vmem [thread:$0]  %s1217_s1, 128, %s34_s25, [#allocation6]  }
   0xf   :  { %s926_s8 = scalar_lea.vmem %s54_s27, 128  ;;  %p931_p6 = scmp.lt.s32.totalorder %s54_s27, %s54_s27 }
  0x10   :  { %p927_p5 = scmp.ne.s32.totalorder %s54_s27, %s926_s8  ;;  %p932_p7 = scmp.lt.s32.totalorder %s926_s8, %s926_s8 }
  0x12   :  { %p933_p8 = por %p932_p7, %p931_p6 }
  0x14   :  { %p934_p9 = pnand %p933_p8, %p927_p5 }
  0x16   :  { %937 = shalt.err (!%p934_p9)
}
  0x17   :  { %56 = dma.hbm_to_vmem [thread:$0]  %s1219_s3, 128, %s54_s27, [#allocation9]  }
  0x18   :  { %s1070_s11 = smov [#allocation11]   ;;  %s1071_s13 = smov [#allocation2]  }
  0x19   :  { %s74_s12 = sshll.u32 %s1070_s11, 4  ;;  %s23_s14 = sshll.u32 %s1071_s13, 4  ;;  %s75_s12 = int_to_ptr.vmem [resolvable:$true] %s74_s12  ;;  %s24_s14 = int_to_ptr.vmem [resolvable:$true] %s23_s14 }
  0x1a   :  { %s946_s15 = scalar_lea.vmem %s75_s12, 1024  ;;  %p951_p11 = scmp.lt.s32.totalorder %s75_s12, %s75_s12 }
  0x1b   :  { %p947_p10 = scmp.ne.s32.totalorder %s75_s12, %s946_s15  ;;  %p952_p12 = scmp.lt.s32.totalorder %s946_s15, %s946_s15 }
  0x1d   :  { %p953_p13 = por %p952_p12, %p951_p11 }
  0x1f   :  { %p954_p0 = pnand %p953_p13, %p947_p10 }
  0x21   :  { %957 = shalt.err (!%p954_p0)
}
  0x22   :  { %s1072_s1 = smov 64   ;;  %s1073_s16 = smov 4  }
  0x23   :  { %80 = dma.hbm_to_vmem [thread:$0]  %s1221_s5, 1024, %s75_s12, [#allocation12], %s1072_s1, %s1072_s1, %s1073_s16  }
  0x24   :  { %s966_s18 = scalar_lea.vmem %s24_s14, 128  ;;  %p971_p2 = scmp.lt.s32.totalorder %s24_s14, %s24_s14 }
  0x25   :  { %p967_p1 = scmp.ne.s32.totalorder %s24_s14, %s966_s18  ;;  %p972_p3 = scmp.lt.s32.totalorder %s966_s18, %s966_s18 }
  0x27   :  { %p973_p4 = por %p972_p3, %p971_p2 }
  0x29   :  { %p974_p5 = pnand %p973_p4, %p967_p1 }
  0x2b   :  { %977 = shalt.err (!%p974_p5)
}
  0x2c   :  { %26 = dma.hbm_to_vmem [thread:$0]  %s1216_s0, 128, %s24_s14, [#allocation3]  }
  0x2d   :  { %s1074_s21 = smov [#allocation7]   ;;  %s1075_s23 = smov [#allocation10]  }
  0x2e   :  { %s43_s22 = sshll.u32 %s1074_s21, 4  ;;  %s62_s24 = sshll.u32 %s1075_s23, 4  ;;  %s44_s22 = int_to_ptr.vmem [resolvable:$true] %s43_s22  ;;  %s63_s24 = int_to_ptr.vmem [resolvable:$true] %s62_s24 }
  0x2f   :  { %s986_s25 = scalar_lea.vmem %s44_s22, 128  ;;  %p991_p7 = scmp.lt.s32.totalorder %s44_s22, %s44_s22 }
  0x30   :  { %p987_p6 = scmp.ne.s32.totalorder %s44_s22, %s986_s25  ;;  %p992_p8 = scmp.lt.s32.totalorder %s986_s25, %s986_s25 }
  0x32   :  { %p993_p9 = por %p992_p8, %p991_p7 }
  0x34   :  { %p994_p10 = pnand %p993_p9, %p987_p6 }
  0x36   :  { %997 = shalt.err (!%p994_p10)
}
  0x37   :  { %46 = dma.hbm_to_vmem [thread:$0]  %s1218_s2, 128, %s44_s22, [#allocation6]  }
  0x38   :  { %s1006_s27 = scalar_lea.vmem %s63_s24, 1024  ;;  %p1011_p12 = scmp.lt.s32.totalorder %s63_s24, %s63_s24 }
  0x39   :  { %p1007_p11 = scmp.ne.s32.totalorder %s63_s24, %s1006_s27  ;;  %p1012_p13 = scmp.lt.s32.totalorder %s1006_s27, %s1006_s27 }
  0x3b   :  { %p1013_p0 = por %p1012_p13, %p1011_p12 }
  0x3d   :  { %p1014_p1 = pnand %p1013_p0, %p1007_p11 }
  0x3f   :  { %1017 = shalt.err (!%p1014_p1)
}
  0x40   :  { %68 = dma.hbm_to_vmem [thread:$0]  %s1220_s4, 1024, %s63_s24, [#allocation9], %s1072_s1, %s1072_s1, %s1073_s16  }
  0x41   :  { %s1076_s29 = smov [#allocation13]  }
  0x42   :  { %s86_s30 = sshll.u32 %s1076_s29, 4  ;;  %s87_s30 = int_to_ptr.vmem [resolvable:$true] %s86_s30 }
  0x43   :  { %s1026_s8 = scalar_lea.vmem %s87_s30, 1024  ;;  %p1031_p3 = scmp.lt.s32.totalorder %s87_s30, %s87_s30 }
  0x44   :  { %p1027_p2 = scmp.ne.s32.totalorder %s87_s30, %s1026_s8  ;;  %p1032_p4 = scmp.lt.s32.totalorder %s1026_s8, %s1026_s8 }
  0x46   :  { %p1033_p5 = por %p1032_p4, %p1031_p3 }
  0x48   :  { %p1034_p6 = pnand %p1033_p5, %p1027_p2 }
  0x4a   :  { %1037 = shalt.err (!%p1034_p6)
}
  0x4b   :  { %92 = dma.hbm_to_vmem [thread:$0]  %s1222_s6, 1024, %s87_s30, [#allocation12], %s1072_s1, %s1072_s1, %s1073_s16  }
  0x4c   :  { %1058 = dma.done.wait [#allocation3], 128  }
  0x4d   :  { %1059 = vsyncadd [#allocation3], 4294967168 }
  0x4e   :  { %1060 = dma.done.wait [#allocation6], 256  }
  0x4f   :  { %1061 = vsyncadd [#allocation6], 4294967040 }
  0x50   :  { %1062 = dma.done.wait [#allocation9], 1152  }
  0x51   :  { %1063 = vsyncadd [#allocation9], 4294966144 }
  0x52   :  { %1064 = dma.done.wait [#allocation12], 2048  }
  0x53   :  { %1065 = vsyncadd [#allocation12], 4294965248  ;;  %v121_v0 = vlaneseq  ;;  %v1077_v1 = vmov 0.0   ;;  %v119_v7 = vld [vmem:[#allocation2] sm:$0xff]  ;;  %v1153_v11 = vld [vmem:[#allocation5] sm:$0xff]  ;;  %vm1078_vm0 = vmmov 0  }
  0x54   :  { %796 = vmatprep.subr.bf16.mxu0 %v1077_v1  ;;  %816 = vmatprep.subr.bf16.mxu1 %v1077_v1  ;;  %v868_v17 = vld [vmem:[#allocation10 + $0x38] sm:$0xff]   ;;  %v869_v20 = vld [vmem:[#allocation10 + $0x30] sm:$0xff]   ;;  %v870_v25 = vld [vmem:[#allocation10 + $0x28] sm:$0xff]   ;;  %vm315_vm1 = vcmask 64512   ;;  %vm361_vm10 = vcmask 1041409   ;;  %vm363_vm11 = vcmask 1042434  }
  0x55   :  { %v124_v2 = vshrl.u32 %v121_v0, 7  ;;  %797 = vmatpush3.bf16.msra.mxu0 %v868_v17  ;;  %v871_v28 = vld [vmem:[#allocation10 + $0x20] sm:$0xff]   ;;  %v872_v31 = vld [vmem:[#allocation10 + $0x18] sm:$0xff]   ;;  %v873_v34 = vld [vmem:[#allocation10 + $0x10] sm:$0xff]   ;;  %812 = vmatprep.mubr.msk.bf16.mxu0 %vm1078_vm0, %v1077_v1  ;;  %v316_v40 = vsel %vm315_vm1, %v1153_v11, 0.0  ;;  %v1184_v47 = vand.u32 127, %v121_v0 }
  0x56   :  { %798 = vmatprep.subr.bf16.mxu0 %v1077_v1  ;;  %v874_v35 = vld [vmem:[#allocation10 + $0x8] sm:$0xff]   ;;  %832 = vmatprep.mubr.msk.bf16.mxu1 %vm1078_vm0, %v1077_v1  ;;  %v875_v36 = vld [vmem:[#allocation10] sm:$0xff]   ;;  %v876_v37 = vld [vmem:[#allocation11 + $0x38] sm:$0xff]   ;;  %vm365_vm12 = vcmask 1043459   ;;  %vm367_vm13 = vcmask 1044484   ;;  %vm369_vm14 = vcmask 1045509  }
  0x57   :  { %v139_v3 = vsub.s32 2, %v124_v2  ;;  %v125_v4 = vsub.s32 0, %v124_v2  ;;  %v146_v5 = vsub.s32 3, %v124_v2  ;;  %v132_v6 = vsub.s32 1, %v124_v2  ;;  %817 = vmatpush3.bf16.msra.mxu1 %v876_v37  ;;  %v877_v38 = vld [vmem:[#allocation11 + $0x30] sm:$0xff]   ;;  %v878_v39 = vld [vmem:[#allocation11 + $0x28] sm:$0xff]  }
  0x58   :  { %v153_v8 = vsub.s32 4, %v124_v2  ;;  %v160_v16 = vsub.s32 5, %v124_v2  ;;  %v167_v21 = vsub.s32 6, %v124_v2  ;;  %v174_v24 = vsub.s32 7, %v124_v2  ;;  %818 = vmatprep.subr.bf16.mxu1 %v1077_v1  ;;  %v879_v41 = vld [vmem:[#allocation11 + $0x20] sm:$0xff]   ;;  %v880_v42 = vld [vmem:[#allocation11 + $0x18] sm:$0xff]  }
  0x59   :  { %v140_v9 = vrot.slane %v119_v7, %v139_v3  ;;  %v126_v10 = vrot.slane %v119_v7, %v125_v4  ;;  %v147_v12 = vrot.slane %v119_v7, %v146_v5  ;;  %v133_v13 = vrot.slane %v119_v7, %v132_v6  ;;  %799 = vmatpush3.bf16.msra.mxu0 %v869_v20  ;;  %v881_v43 = vld [vmem:[#allocation11 + $0x10] sm:$0xff]   ;;  %v882_v44 = vld [vmem:[#allocation11 + $0x8] sm:$0xff]   ;;  %s1079_s4 = smov [#allocation14]  }
  0x5a   :  { %v213_v14 = vrot.slane %v1153_v11, %v132_v6  ;;  %v206_v15 = vrot.slane %v1153_v11, %v125_v4  ;;  %v220_v18 = vrot.slane %v1153_v11, %v139_v3  ;;  %v154_v19 = vrot.slane %v119_v7, %v153_v8  ;;  %800 = vmatprep.subr.bf16.mxu0 %v1077_v1  ;;  %s720_s6 = sshll.u32 %s1079_s4, 4  ;;  %s721_s6 = int_to_ptr.vmem [resolvable:$true] %s720_s6 }
  0x5b   :  { %142 = vbcast.lane.b32.xlu1 %v140_v9, 256  ;;  %128 = vbcast.lane.b32.xlu0 %v126_v10, 256  ;;  %v227_v22 = vrot.slane %v1153_v11, %v146_v5  ;;  %v161_v23 = vrot.slane %v119_v7, %v160_v16  ;;  %v234_v26 = vrot.slane %v1153_v11, %v153_v8  ;;  %vm371_vm15 = vcmask 1046534   ;;  %s1038_s10 = scalar_lea.vmem %s721_s6, 128  ;;  %p1043_p8 = scmp.lt.s32.totalorder %s721_s6, %s721_s6 }
  0x5c   :  { %v168_v27 = vrot.slane %v119_v7, %v167_v21  ;;  %v241_v29 = vrot.slane %v1153_v11, %v160_v16  ;;  %v175_v30 = vrot.slane %v119_v7, %v174_v24  ;;  %v255_v32 = vrot.slane %v1153_v11, %v174_v24  ;;  %819 = vmatpush3.bf16.msra.mxu1 %v877_v38  ;;  %p1039_p7 = scmp.ne.s32.totalorder %s721_s6, %s1038_s10  ;;  %p1044_p9 = scmp.lt.s32.totalorder %s1038_s10, %s1038_s10 }
  0x5d   :  { %801 = vmatpush3.bf16.msra.mxu0 %v870_v25  ;;  %v248_v33 = vrot.slane %v1153_v11, %v167_v21  ;;  %820 = vmatprep.subr.bf16.mxu1 %v1077_v1  ;;  %vm373_vm1 = vcmask 1047559  }
  0x5e   :  { %802 = vmatprep.subr.bf16.mxu0 %v1077_v1  ;;  %p1045_p10 = por %p1044_p9, %p1043_p8 }
  0x5f   :  { %149 = vbcast.lane.b32.xlu1 %v147_v12, 256  ;;  %135 = vbcast.lane.b32.xlu0 %v133_v13, 256 }
  0x60   :  { %821 = vmatpush3.bf16.msra.mxu1 %v878_v39  ;;  %p1046_p11 = pnand %p1045_p10, %p1039_p7 }
  0x61   :  { %803 = vmatpush3.bf16.msra.mxu0 %v871_v28  ;;  %822 = vmatprep.subr.bf16.mxu1 %v1077_v1 }
  0x62   :  { %804 = vmatprep.subr.bf16.mxu0 %v1077_v1 }
  0x63   :  { %215 = vbcast.lane.b32.xlu1 %v213_v14, 256  ;;  %208 = vbcast.lane.b32.xlu0 %v206_v15, 256 }
  0x64   :  { %823 = vmatpush3.bf16.msra.mxu1 %v879_v41 }
  0x65   :  { %805 = vmatpush3.bf16.msra.mxu0 %v872_v31  ;;  %824 = vmatprep.subr.bf16.mxu1 %v1077_v1 }
  0x66   :  { %806 = vmatprep.subr.bf16.mxu0 %v1077_v1 }
  0x67   :  { %222 = vbcast.lane.b32.xlu1 %v220_v18, 256  ;;  %156 = vbcast.lane.b32.xlu0 %v154_v19, 256 }
  0x68   :  { %825 = vmatpush3.bf16.msra.mxu1 %v880_v42 }
  0x69   :  { %807 = vmatpush3.bf16.msra.mxu0 %v873_v34  ;;  %826 = vmatprep.subr.bf16.mxu1 %v1077_v1 }
  0x6a   :  { %808 = vmatprep.subr.bf16.mxu0 %v1077_v1 }
  0x6b   :  { %229 = vbcast.lane.b32.xlu1 %v227_v22, 256  ;;  %163 = vbcast.lane.b32.xlu0 %v161_v23, 256 }
  0x6c   :  { %827 = vmatpush3.bf16.msra.mxu1 %v881_v43 }
  0x6d   :  { %809 = vmatpush3.bf16.msra.mxu0 %v874_v35  ;;  %828 = vmatprep.subr.bf16.mxu1 %v1077_v1 }
  0x6e   :  { %810 = vmatprep.subr.bf16.mxu0 %v1077_v1 }
  0x6f   :  { %236 = vbcast.lane.b32.xlu1 %v234_v26, 256  ;;  %170 = vbcast.lane.b32.xlu0 %v168_v27, 256 }
  0x70   :  { %829 = vmatpush3.bf16.msra.mxu1 %v882_v44 }
  0x71   :  { %811 = vmatpush3.bf16.msra.mxu0 %v875_v36  ;;  %830 = vmatprep.subr.bf16.mxu1 %v1077_v1 }
  0x72   :  { %836 = vmatprep.subr.bf16.mxu0 %v1077_v1 }
  0x73   :  { %243 = vbcast.lane.b32.xlu1 %v241_v29, 256  ;;  %177 = vbcast.lane.b32.xlu0 %v175_v30, 256 }
  0x77   :  { %257 = vbcast.lane.b32.xlu1 %v255_v32, 256  ;;  %250 = vbcast.lane.b32.xlu0 %v248_v33, 256 }
  0x96   :  { %317 = vadd.xlane.f32.xlu0 %v316_v40 }
  0xcd   :  { %v143_v45 = vpop.permute.xlu1 %142  ;;  %v129_v46 = vpop.permute.xlu0 %128 }
  0xce   :  { %vm179_vm2 = vcmp.eq.s32.totalorder %v129_v46, %v1184_v47  ;;  %vm181_vm4 = vcmp.eq.s32.totalorder %v143_v45, %v1184_v47 }
  0xcf   :  { %v732_v52 = vsel %vm179_vm2, 1.0, %v1077_v1  ;;  %v734_v58 = vsel %vm181_vm4, 1.0, %v1077_v1 }
  0xd1   :  { %v150_v48 = vpop.permute.xlu1 %149  ;;  %v136_v49 = vpop.permute.xlu0 %135 }
  0xd2   :  { %vm180_vm3 = vcmp.eq.s32.totalorder %v136_v49, %v1184_v47  ;;  %vm182_vm5 = vcmp.eq.s32.totalorder %v150_v48, %v1184_v47 }
  0xd3   :  { %v733_v51 = vsel %vm180_vm3, 1.0, %v1077_v1  ;;  %v735_v2 = vsel %vm182_vm5, 1.0, %v1077_v1 }
  0xd5   :  { %v216_v50 = vpop.permute.xlu1 %215  ;;  %v209_v53 = vpop.permute.xlu0 %208 }
  0xd6   :  { %v260_v54 = vmul.f32 %v733_v51, %v216_v50  ;;  %v259_v55 = vmul.f32 %v732_v52, %v209_v53 }
  0xd8   :  { %v273_v56 = vrot.slane %v260_v54, 4  ;;  %v267_v57 = vrot.slane %v259_v55, 4 }
  0xd9   :  { %v223_v59 = vpop.permute.xlu1 %222  ;;  %v157_v60 = vpop.permute.xlu0 %156 }
  0xda   :  { %v274_v61 = vadd.f32 %v273_v56, %v260_v54  ;;  %v261_v62 = vmul.f32 %v734_v58, %v223_v59  ;;  %v268_v63 = vadd.f32 %v267_v57, %v259_v55  ;;  %vm183_vm6 = vcmp.eq.s32.totalorder %v157_v60, %v1184_v47 }
  0xdb   :  { %v736_v15 = vsel %vm183_vm6, 1.0, %v1077_v1 }
  0xdc   :  { %v279_v0 = vrot.slane %v261_v62, 4  ;;  %v275_v5 = vrot.slane %v274_v61, 2  ;;  %v269_v8 = vrot.slane %v268_v63, 2 }
  0xdd   :  { %v230_v3 = vpop.permute.xlu1 %229  ;;  %v164_v4 = vpop.permute.xlu0 %163 }
  0xde   :  { %v280_v6 = vadd.f32 %v279_v0, %v261_v62  ;;  %v262_v7 = vmul.f32 %v735_v2, %v230_v3  ;;  %v276_v13 = vadd.f32 %v275_v5, %v274_v61  ;;  %v270_v16 = vadd.f32 %v269_v8, %v268_v63 }
  0xdf   :  { %vm184_vm7 = vcmp.eq.s32.totalorder %v164_v4, %v1184_v47 }
  0xe0   :  { %v281_v9 = vrot.slane %v280_v6, 2  ;;  %v285_v10 = vrot.slane %v262_v7, 4  ;;  %v277_v23 = vrot.slane %v276_v13, 1  ;;  %v737_v25 = vsel %vm184_vm7, 1.0, %v1077_v1 }
  0xe1   :  { %v237_v11 = vpop.permute.xlu1 %236  ;;  %v171_v12 = vpop.permute.xlu0 %170  ;;  %v271_v26 = vrot.slane %v270_v16, 1 }
  0xe2   :  { %v286_v14 = vadd.f32 %v285_v10, %v262_v7  ;;  %v263_v17 = vmul.f32 %v736_v15, %v237_v11  ;;  %v282_v18 = vadd.f32 %v281_v9, %v280_v6  ;;  %vm185_vm8 = vcmp.eq.s32.totalorder %v171_v12, %v1184_v47 }
  0xe3   :  { %v738_v30 = vsel %vm185_vm8, 1.0, %v1077_v1  ;;  %v278_v39 = vadd.f32 %v277_v23, %v276_v13  ;;  %v272_v40 = vadd.f32 %v271_v26, %v270_v16 }
  0xe4   :  { %v287_v19 = vrot.slane %v286_v14, 2  ;;  %v291_v20 = vrot.slane %v263_v17, 4  ;;  %v283_v29 = vrot.slane %v282_v18, 1 }
  0xe5   :  { %v244_v21 = vpop.permute.xlu1 %243  ;;  %v178_v22 = vpop.permute.xlu0 %177  ;;  %v322_v52 = vpack.c.bf16 %v278_v39, %v278_v39  ;;  %v321_v53 = vpack.c.bf16 %v272_v40, %v272_v40 }
  0xe6   :  { %v288_v24 = vadd.f32 %v287_v19, %v286_v14  ;;  %v292_v27 = vadd.f32 %v291_v20, %v263_v17  ;;  %v264_v28 = vmul.f32 %v737_v25, %v244_v21  ;;  %vm186_vm9 = vcmp.eq.s32.totalorder %v178_v22, %v1184_v47  ;;  %v883_v25 = vld [vmem:[#allocation11] sm:$0xff]  }
  0xe7   :  { %v739_v35 = vsel %vm186_vm9, 1.0, %v1077_v1  ;;  %v284_v43 = vadd.f32 %v283_v29, %v282_v18  ;;  %v354_v0 = vunpack.c.l.b16 %v322_v52  ;;  %v353_v2 = vunpack.c.l.b16 %v321_v53  ;;  %831 = vmatpush3.bf16.msra.mxu1 %v883_v25  ;;  %v887_v52 = vld [vmem:[#allocation13 + $0x20] sm:$0xff]   ;;  %v888_v53 = vld [vmem:[#allocation13 + $0x18] sm:$0xff]  }
  0xe8   :  { %v289_v31 = vrot.slane %v288_v24, 1  ;;  %v293_v32 = vrot.slane %v292_v27, 2  ;;  %v297_v33 = vrot.slane %v264_v28, 4 }
  0xe9   :  { %v258_v34 = vpop.permute.xlu1 %257  ;;  %v251_v36 = vpop.permute.xlu0 %250  ;;  %v323_v56 = vpack.c.bf16 %v284_v43, %v284_v43  ;;  %v362_v12 = vsel %vm361_vm10, %v354_v0, %v353_v2  ;;  %v602_v2 = vld [vmem:[#allocation7] sm:$0xff] }
  0xea   :  { %v266_v37 = vmul.f32 %v739_v35, %v258_v34  ;;  %v265_v38 = vmul.f32 %v738_v30, %v251_v36  ;;  %v294_v41 = vadd.f32 %v293_v32, %v292_v27  ;;  %v298_v42 = vadd.f32 %v297_v33, %v264_v28  ;;  %v748_v35 = vld [vmem:[#allocation8] ss:$0 sm:$0xff] }
  0xeb   :  { %v290_v46 = vadd.f32 %v289_v31, %v288_v24  ;;  %v355_v4 = vunpack.c.l.b16 %v323_v56  ;;  %v891_v56 = vld [vmem:[#allocation13] sm:$0xff]  }
  0xec   :  { %v309_v44 = vrot.slane %v266_v37, 4  ;;  %v303_v45 = vrot.slane %v265_v38, 4  ;;  %v295_v48 = vrot.slane %v294_v41, 1  ;;  %v299_v49 = vrot.slane %v298_v42, 2 }
  0xed   :  { %v324_v59 = vpack.c.bf16 %v290_v46, %v290_v46  ;;  %v364_v14 = vsel %vm363_vm11, %v355_v4, %v362_v12 }
  0xee   :  { %v310_v50 = vadd.f32 %v309_v44, %v266_v37  ;;  %v304_v51 = vadd.f32 %v303_v45, %v265_v38  ;;  %v296_v54 = vadd.f32 %v295_v48, %v294_v41  ;;  %v300_v55 = vadd.f32 %v299_v49, %v298_v42  ;;  %v884_v44 = vld [vmem:[#allocation13 + $0x38] sm:$0xff]  }
  0xef   :  { %v356_v7 = vunpack.c.l.b16 %v324_v59 }
  0xf0   :  { %v311_v57 = vrot.slane %v310_v50, 2  ;;  %v305_v58 = vrot.slane %v304_v51, 2  ;;  %v301_v60 = vrot.slane %v300_v55, 1  ;;  %v325_v61 = vpack.c.bf16 %v296_v54, %v296_v54  ;;  %v889_v54 = vld [vmem:[#allocation13 + $0x10] sm:$0xff]  }
  0xf1   :  { %v366_v17 = vsel %vm365_vm12, %v356_v7, %v364_v14 }
  0xf2   :  { %v312_v62 = vadd.f32 %v311_v57, %v310_v50  ;;  %v306_v63 = vadd.f32 %v305_v58, %v304_v51  ;;  %v302_v3 = vadd.f32 %v301_v60, %v300_v55  ;;  %v357_v9 = vunpack.c.l.b16 %v325_v61  ;;  %v885_v51 = vld [vmem:[#allocation13 + $0x30] sm:$0xff]   ;;  %v890_v55 = vld [vmem:[#allocation13 + $0x8] sm:$0xff]   ;;  %v758_v61 = vld [vmem:[#allocation8 + $0x1] ss:$0 sm:$0xff] }
  0xf4   :  { %v313_v5 = vrot.slane %v312_v62, 1  ;;  %v307_v6 = vrot.slane %v306_v63, 1  ;;  %v326_v8 = vpack.c.bf16 %v302_v3, %v302_v3  ;;  %v368_v20 = vsel %vm367_vm13, %v357_v9, %v366_v17 }
  0xf6   :  { %v314_v10 = vadd.f32 %v313_v5, %v312_v62  ;;  %v308_v11 = vadd.f32 %v307_v6, %v306_v63  ;;  %v358_v13 = vunpack.c.l.b16 %v326_v8  ;;  %v759_v63 = vld [vmem:[#allocation8 + $0x2] ss:$0 sm:$0xff]  ;;  %v760_v6 = vld [vmem:[#allocation8 + $0x3] ss:$0 sm:$0xff] }
  0xf8   :  { %v328_v15 = vpack.c.bf16 %v314_v10, %v314_v10  ;;  %v327_v16 = vpack.c.bf16 %v308_v11, %v308_v11  ;;  %v370_v21 = vsel %vm369_vm14, %v358_v13, %v368_v20 }
  0xfa   :  { %v360_v18 = vunpack.c.l.b16 %v328_v15  ;;  %v359_v19 = vunpack.c.l.b16 %v327_v16 }
  0xfc   :  { %v372_v22 = vsel %vm371_vm15, %v359_v19, %v370_v21 }
  0xfd   :  { %v374_v23 = vsel %vm373_vm1, %v360_v18, %v372_v22 }
  0xfe   :  { %v375_v24 = vpack.c.b16 %v374_v23, %v374_v23 }
 0x100   :  { %813 = vmatmul.mubr.bf16.vlgmr.msra.gmra.mxu0 %v375_v24 }
 0x101   :  { %852 = vmatprep.mubr.msk.bf16.mxu0 %vm1078_vm0, %v1077_v1  ;;  %vm576_vm0 = vcmp.lt.s32.totalorder %v1184_v47, 32  ;;  %837 = vmatpush3.bf16.msra.mxu0 %v884_v44  ;;  %v886_v47 = vld [vmem:[#allocation13 + $0x28] sm:$0xff]  }
 0x102   :  { %v757_v41 = vsel %vm576_vm0, 1.0, %v1077_v1  ;;  %838 = vmatprep.subr.bf16.mxu0 %v1077_v1 }
 0x105   :  { %839 = vmatpush3.bf16.msra.mxu0 %v885_v51 }
 0x106   :  { %840 = vmatprep.subr.bf16.mxu0 %v1077_v1 }
 0x109   :  { %841 = vmatpush3.bf16.msra.mxu0 %v886_v47 }
 0x10a   :  { %842 = vmatprep.subr.bf16.mxu0 %v1077_v1 }
 0x10d   :  { %843 = vmatpush3.bf16.msra.mxu0 %v887_v52 }
 0x10e   :  { %844 = vmatprep.subr.bf16.mxu0 %v1077_v1 }
 0x111   :  { %845 = vmatpush3.bf16.msra.mxu0 %v888_v53 }
 0x112   :  { %846 = vmatprep.subr.bf16.mxu0 %v1077_v1 }
 0x115   :  { %847 = vmatpush3.bf16.msra.mxu0 %v889_v54 }
 0x116   :  { %848 = vmatprep.subr.bf16.mxu0 %v1077_v1 }
 0x119   :  { %849 = vmatpush3.bf16.msra.mxu0 %v890_v55 }
 0x11a   :  { %850 = vmatprep.subr.bf16.mxu0 %v1077_v1 }
 0x11d   :  { %851 = vmatpush3.bf16.msra.mxu0 %v891_v56 }
 0x11f   :  { %v318_v26 = vpop.xlane.xlu0 %317 }
 0x120   :  { %v319_v27 = vmax.f32 %v318_v26, 1.0 }
 0x122   :  { %892 = vrcp.f32 %v319_v27 }
 0x12f   :  { %v893_v28 = vpop.eup %892 }
 0x1c0   :  { %v459_v29 = vpop.f32.mrf.mxu0 }
 0x1c1   :  { %v465_v30 = vmul.f32 %v893_v28, %v459_v29 }
 0x1c2   :  { %v814_v31 = vpop.f32.mrf.mxu0 }
 0x1c3   :  { %v466_v32 = vpack.c.bf16 %v465_v30, %v465_v30 }
 0x1c4   :  { %v462_v33 = vpop.f32.mrf.mxu0 }
 0x1c5   :  { %833 = vmatmul.mubr.bf16.vlgmr.msra.gmra.mxu1 %v466_v32 }
 0x1c6   :  { %v815_v34 = vpop.f32.mrf.mxu0 }
 0x285   :  { %v569_v36 = vpop.f32.mrf.mxu1 }
 0x286   :  { %v570_v37 = vadd.f32 %v748_v35, %v569_v36 }
 0x287   :  { %v834_v38 = vpop.f32.mrf.mxu1 }
 0x288   :  { %894 = vtanh.f32 %v570_v37 }
 0x289   :  { %v572_v39 = vpop.f32.mrf.mxu1 }
 0x28b   :  { %v835_v40 = vpop.f32.mrf.mxu1 }
 0x295   :  { %v895_v42 = vpop.eup %894 }
 0x296   :  { %v579_v43 = vmul.f32 %v895_v42, %v757_v41 }
 0x298   :  { %580 = vadd.xlane.f32.xlu1 %v579_v43 }
 0x321   :  { %v581_v45 = vpop.xlane.xlu1 %580 }
 0x322   :  { %v582_v46 = vmul.f32 0.03125, %v581_v45 }
 0x324   :  { %v583_v48 = vsub.f32 %v579_v43, %v582_v46 }
 0x326   :  { %v584_v49 = vmul.f32 %v757_v41, %v583_v48 }
 0x328   :  { %v585_v50 = vmul.f32 %v584_v49, %v584_v49 }
 0x32a   :  { %586 = vadd.xlane.f32.xlu0 %v585_v50 }
 0x3b3   :  { %v587_v57 = vpop.xlane.xlu0 %586 }
 0x3b4   :  { %v588_v58 = vmul.f32 0.03125, %v587_v57 }
 0x3b6   :  { %v589_v59 = vadd.f32 1e-05, %v588_v58 }
 0x3b8   :  { %896 = vrsqrt.f32 %v589_v59 }
 0x3c5   :  { %v897_v60 = vpop.eup %896 }
 0x3c6   :  { %v591_v62 = vmul.f32 %v897_v60, %v584_v49 }
 0x3c8   :  { %v596_v0 = vmul.f32 %v758_v61, %v591_v62 }
 0x3ca   :  { %v601_v3 = vadd.f32 %v759_v63, %v596_v0 }
 0x3cc   :  { %v603_v4 = vmul.f32 %v602_v2, %v601_v3 }
 0x3ce   :  { %v604_v5 = vpack.c.bf16 %v603_v4, %v603_v4 }
 0x3d0   :  { %853 = vmatmul.mubr.bf16.vlgmr.msra.gmra.mxu0 %v604_v5 }
 0x490   :  { %v707_v7 = vpop.f32.mrf.mxu0 }
 0x491   :  { %v708_v1 = vadd.f32 %v760_v6, %v707_v7 }
 0x492   :  { %v854_v8 = vpop.f32.mrf.mxu0 }
 0x493   :  { %713 = vst [vmem:[#allocation14] sm:$0xff] %v708_v1 }
 0x494   :  { %v710_v9 = vpop.f32.mrf.mxu0 }
 0x495   :  { %1049 = shalt.err (!%p1046_p11)
}
 0x496   :  { %723 = dma.vmem_to_hbm [thread:$0]  %s721_s6, 128, %s1223_s7, [#allocation4]   ;;  %v855_v10 = vpop.f32.mrf.mxu0 }
 0x497   :  { %1066 = dma.done.wait [#allocation4], 128  }
 0x498   :  { %1067 = vsyncadd [#allocation4], 4294967168 }
 0x499   :  { %727 = vsyncpa [#allocation3], 1 }
 0x49a   :  { %728 = vsyncpa [#allocation6], 1 }
 0x49b   :  { %729 = vsyncpa [#allocation9], 1 }
 0x49c   :  { %730 = vsyncpa [#allocation12], 1 }
 0x49d   :  { %731 = vsyncpa [#allocation4], 1 }

</bundles_post_ra>
